<compile_context>
chip_gen: v7x
topology: tpu7x:2x2x1
jax: 0.10.0
libtpu: 0.0.40
codegen_flags: <defaults>
</compile_context>

<pallas_src>
import functools

import jax
import jax.numpy as jnp
from jax import lax
from jax.experimental import pallas as pl
from jax.experimental.pallas import tpu as pltpu


# --------------------------------------------------------------------------- #
# Preamble: L2-normalize (torch cos_sim semantics: x / max(||x||, 1e-8)),
# optionally fold the loss scale in, and emit bf16 MXU operands.
# --------------------------------------------------------------------------- #
def _normalize_kernel(x_ref, o_ref, *, scale):
    x = x_ref[...].astype(jnp.float32)
    ssq = jnp.sum(x * x, axis=-1, keepdims=True)
    # clamp sum-of-squares at eps**2 to preserve the torch eps-on-norm semantics,
    # then rsqrt (EUP slot) instead of divide-by-sqrt (VPU).
    inv = lax.rsqrt(jnp.maximum(ssq, 1e-16))
    o_ref[...] = (x * (inv * scale)).astype(o_ref.dtype)


def _l2_normalize_scaled(x, scale, preferred_tile=256):
    rows, d = x.shape
    tr = _choose_tile(rows, preferred_tile)
    kernel = functools.partial(_normalize_kernel, scale=scale)
    return pl.pallas_call(
        kernel,
        out_shape=jax.ShapeDtypeStruct((rows, d), jnp.bfloat16),
        grid=(rows // tr,),
        in_specs=[pl.BlockSpec((tr, d), lambda i: (i, 0))],
        out_specs=pl.BlockSpec((tr, d), lambda i: (i, 0)),
        compiler_params=pltpu.CompilerParams(
            dimension_semantics=("parallel",),
            vmem_limit_bytes=32 * 1024 * 1024,
        ),
    )(x)


# --------------------------------------------------------------------------- #
# Main kernel: tiled cos-sim matmul + online logsumexp, direct diagonal.
# Grid = (N // TM, M // TN); column (reduction) axis last.
# --------------------------------------------------------------------------- #
def _mnr_tiled_kernel(a_ref, bcol_ref, bpos_ref, out_ref, m_sc, l_sc):
    j = pl.program_id(1)

    @pl.when(j == 0)
    def _():
        m_sc[...] = jnp.full(m_sc.shape, -jnp.inf, dtype=m_sc.dtype)
        l_sc[...] = jnp.zeros(l_sc.shape, dtype=l_sc.dtype)

    # (TM, TN) scores tile on the MXU: contract both operands over the lane (D)
    # axis directly (no b.T relayout); bf16 operands, f32 accumulation.
    # `scale` is already folded into the A-side normalization.
    s = lax.dot_general(
        a_ref[...], bcol_ref[...],
        dimension_numbers=(((1,), (1,)), ((), ())),
        preferred_element_type=jnp.float32,
    )

    # Online logsumexp update.
    m_prev = m_sc[...]
    m_new = jnp.maximum(m_prev, jnp.max(s, axis=-1, keepdims=True))
    alpha = jnp.exp(m_prev - m_new)
    l_sc[...] = alpha * l_sc[...] + jnp.sum(jnp.exp(s - m_new), axis=-1, keepdims=True)
    m_sc[...] = m_new

    @pl.when(j == pl.num_programs(1) - 1)
    def _():
        lse = m_sc[...] + jnp.log(l_sc[...])
        # Positive score for row r is just <a_n[r], b_n[r]> (scale folded into a_n):
        # no (TM, TN) iota/compare/select temporaries, no second full-row reduction.
        diag = jnp.sum(
            a_ref[...].astype(jnp.float32) * bpos_ref[...].astype(jnp.float32),
            axis=-1, keepdims=True,
        )
        out_ref[...] = lse - diag


def _choose_tile(dim, preferred):
    for t in (preferred, 512, 256, 128, 64, 32, 16, 8):
        if t <= dim and dim % t == 0:
            return t
    return dim


def multiple_negatives_ranking_loss(embeddings_a, embeddings_b, scale=20.0,
                                    tm=256, tn=256):
    """embeddings_a: (N, D), embeddings_b: (M, D) with positives in rows [0, N).

    Returns the scalar f32 loss.  Real embedding dims (384/768/1024) map best to
    the 128-lane axis; tiny D (e.g. the toy test's 32) underfills MXU/lanes.
    """
    N, D = embeddings_a.shape
    M, Db = embeddings_b.shape
    assert D == Db, "embedding dims must match"
    assert M >= N, "embeddings_b must contain the positives in its first N rows"
    assert N % 8 == 0 and M % 8 == 0, "row counts must be multiples of 8 (sublanes)"

    # Normalize each side exactly once; fold `scale` into the A side so the
    # per-tile (TM, TN) score scaling multiply disappears.
    a_n = _l2_normalize_scaled(embeddings_a, scale)   # (N, D) bf16, scaled
    b_n = _l2_normalize_scaled(embeddings_b, 1.0)     # (M, D) bf16

    TM = _choose_tile(N, tm)   # 256-multiples preferred (v6e/v7x MXU granule)
    TN = _choose_tile(M, tn)

    per_row = pl.pallas_call(
        _mnr_tiled_kernel,
        out_shape=jax.ShapeDtypeStruct((N, 1), jnp.float32),
        grid_spec=pltpu.PrefetchScalarGridSpec(
            num_scalar_prefetch=0,
            grid=(N // TM, M // TN),
            in_specs=[
                pl.BlockSpec((TM, D), lambda i, j: (i, 0)),  # a_n row tile (resident over j)
                pl.BlockSpec((TN, D), lambda i, j: (j, 0)),  # b_n column tile (streamed)
                pl.BlockSpec((TM, D), lambda i, j: (i, 0)),  # b_n positive rows for the diag
            ],
            out_specs=pl.BlockSpec((TM, 1), lambda i, j: (i, 0)),
            scratch_shapes=[
                pltpu.VMEM((TM, 1), jnp.float32),   # running max
                pltpu.VMEM((TM, 1), jnp.float32),   # running sum-exp
            ],
        ),
        compiler_params=pltpu.CompilerParams(
            # row tiles are independent (v7x: split across the 2 TensorCores);
            # column axis is the reduction -> last + arbitrary.
            dimension_semantics=("parallel", "arbitrary"),
            vmem_limit_bytes=32 * 1024 * 1024,      # comfortably below v7x's 64 MiB
        ),
    )(a_n, b_n, b_n)

    # Tiny final reduction over N rows; done in XLA to keep the row grid axis
    # truly parallel (no shared-scalar accumulation across cores).
    return jnp.mean(per_row)


# --------------------------------------------------------------------------- #
# Pure-JAX reference (f32 end-to-end).
# --------------------------------------------------------------------------- #
def _reference_loss(a, b, scale=20.0):
    a = a.astype(jnp.float32)
    b = b.astype(jnp.float32)
    a_n = a / jnp.maximum(jnp.linalg.norm(a, axis=-1, keepdims=True), 1e-8)
    b_n = b / jnp.maximum(jnp.linalg.norm(b, axis=-1, keepdims=True), 1e-8)
    scores = a_n @ b_n.T * scale
    logp = jax.nn.log_softmax(scores, axis=-1)
    return -jnp.mean(logp[jnp.arange(a.shape[0]), jnp.arange(a.shape[0])])


if __name__ == "__main__":
    # N anchors, each with 1 positive + 1 hard negative -> M = 2 * N columns.
    N, D = 8, 32
    M = 2 * N

    key = jax.random.PRNGKey(0)
    ka, kb = jax.random.split(key)
    embeddings_a = jax.random.normal(ka, (N, D), dtype=jnp.float32)
    embeddings_b = jax.random.normal(kb, (M, D), dtype=jnp.float32)

    loss = multiple_negatives_ranking_loss(embeddings_a, embeddings_b, scale=20.0)
    loss = jax.block_until_ready(loss)

    ref = _reference_loss(embeddings_a, embeddings_b, scale=20.0)
    # bf16 MXU operands shift the scalar loss slightly vs the f32 reference.
    assert jnp.allclose(loss, ref, atol=5e-2, rtol=1e-2), (loss, ref)

    print("KERNEL_OK")
</pallas_src>

<mosaic_0001>
module attributes {stable_mosaic.version = 11 : i64} {
  func.func @_normalize_kernel(%arg0: i32, %arg1: memref<8x32xf32, #tpu.memory_space<vmem>>, %arg2: memref<8x32xbf16, #tpu.memory_space<vmem>>) attributes {dimension_semantics = [#tpu.dimension_semantics<parallel>], iteration_bounds = array<i64: 1>, scalar_prefetch = 0 : i64, scratch_operands = 0 : i64, tpu.core_type = #tpu.core_type<tc>, window_params = [{transform_indices = @transform_0, window_bounds = array<i64: 8, 32>}, {transform_indices = @transform_1, window_bounds = array<i64: 8, 32>}]} {
    %c0 = arith.constant 0 : index
    %c0_0 = arith.constant 0 : index
    %0 = vector.load %arg1[%c0, %c0_0] : memref<8x32xf32, #tpu.memory_space<vmem>>, vector<8x32xf32>
    %1 = arith.mulf %0, %0 : vector<8x32xf32>
    %cst = arith.constant dense<0.000000e+00> : vector<8xf32>
    %2 = vector.multi_reduction <add>, %1, %cst [1] : vector<8x32xf32> to vector<8xf32>
    %3 = vector.shape_cast %2 : vector<8xf32> to vector<8x1xf32>
    %cst_1 = arith.constant 1.000000e-16 : f32
    %4 = vector.broadcast %cst_1 : f32 to vector<8x1xf32>
    %5 = arith.maximumf %3, %4 : vector<8x1xf32>
    %6 = math.rsqrt %5 : vector<8x1xf32>
    %cst_2 = arith.constant 2.000000e+01 : f32
    %7 = vector.broadcast %cst_2 : f32 to vector<8x1xf32>
    %8 = arith.mulf %6, %7 : vector<8x1xf32>
    %9 = vector.broadcast %8 : vector<8x1xf32> to vector<8x32xf32>
    %10 = arith.mulf %0, %9 : vector<8x32xf32>
    %11 = arith.truncf %10 : vector<8x32xf32> to vector<8x32xbf16>
    %c0_3 = arith.constant 0 : index
    %c0_4 = arith.constant 0 : index
    %12 = vector.load %arg2[%c0_3, %c0_4] : memref<8x32xbf16, #tpu.memory_space<vmem>>, vector<8x32xbf16>
    tpu.vector_store %arg2[%c0_3, %c0_4], %11 {strides = array<i32>} : memref<8x32xbf16, #tpu.memory_space<vmem>>, vector<8x32xbf16>,
    return
  }
  func.func @transform_0(%arg0: i32) -> (i32, i32) {
    %c0_i32 = arith.constant 0 : i32
    %c0_i32_0 = arith.constant 0 : i32
    return %arg0, %c0_i32 : i32, i32
  }
  func.func @transform_1(%arg0: i32) -> (i32, i32) {
    %c0_i32 = arith.constant 0 : i32
    %c0_i32_0 = arith.constant 0 : i32
    return %arg0, %c0_i32 : i32, i32
  }
}

</mosaic_0001>

<bundles_post_ra>
// kernel: tpu_custom_call.1
= control target key start
LH: loop header
LB: loop body
LE: loop exit
PB: predicated region body
PF: predicated region fallthrough
CT: control target
= control target key end

     0   :  { %6 = vsyncpa [#allocation3], 0  ;;  %s137_s0 = inlined_call_operand.hbm [shape: f32[8,32], index: 0, kind: input, shape index: {}]   ;;  %s138_s1 = inlined_call_operand.hbm [shape: bf16[8,32], index: 1, kind: output, shape index: {}]  }
   0x1   :  { %7 = vsyncpa [#allocation4], 0  ;;  %s101_s6 = smov [#allocation2]   ;;  %s53_s10 = scalar_lea.hbm %s137_s0, 128 }
   0x2   :  { %s14_s7 = sshll.u32 %s101_s6, 4  ;;  %p54_p0 = scmp.ne.s32.totalorder %s137_s0, %s53_s10  ;;  %s15_s7 = int_to_ptr.vmem [resolvable:$true] %s14_s7 }
   0x3   :  { %p57_p1 = scmp.lt.u32.totalorder %s53_s10, %s137_s0 }
   0x5   :  { %p59_p2 = pnand %p57_p1, %p54_p0 }
   0x7   :  { %62 = shalt.err (!%p59_p2)
}
   0x8   :  { %s63_s15 = scalar_lea.vmem %s15_s7, 128  ;;  %p68_p4 = scmp.lt.s32.totalorder %s15_s7, %s15_s7 }
   0x9   :  { %p64_p3 = scmp.ne.s32.totalorder %s15_s7, %s63_s15  ;;  %p69_p5 = scmp.lt.s32.totalorder %s63_s15, %s63_s15 }
   0xb   :  { %p70_p6 = por %p69_p5, %p68_p4 }
   0xd   :  { %p71_p7 = pnand %p70_p6, %p64_p3 }
   0xf   :  { %74 = shalt.err (!%p71_p7)
}
  0x10   :  { %17 = dma.hbm_to_vmem [thread:$0]  %s137_s0, 128, %s15_s7, [#allocation3]  }
  0x11   :  { %97 = dma.done.wait [#allocation3], 128  }
  0x12   :  { %98 = vsyncadd [#allocation3], 4294967168  ;;  %v21_v0 = vld [vmem:[#allocation2] sm:$0xff]  ;;  %vm23_vm0 = vcmask 261120   ;;  %s102_s18 = smov [#allocation5]   ;;  %vm32_vm1 = vcmask 257024  }
  0x13   :  { %v22_v1 = vmul.f32 %v21_v0, %v21_v0  ;;  %s40_s19 = sshll.u32 %s102_s18, 4  ;;  %s41_s19 = int_to_ptr.vmem [resolvable:$true] %s40_s19 }
  0x14   :  { %s75_s0 = scalar_lea.vmem %s41_s19, 64  ;;  %p80_p9 = scmp.lt.s32.totalorder %s41_s19, %s41_s19 }
  0x15   :  { %v24_v2 = vsel %vm23_vm0, %v22_v1, 0.0  ;;  %p76_p8 = scmp.ne.s32.totalorder %s41_s19, %s75_s0  ;;  %p81_p10 = scmp.lt.s32.totalorder %s75_s0, %s75_s0 }
  0x16   :  { %25 = vadd.xlane.f32.xlu0 %v24_v2 }
  0x17   :  { %p82_p11 = por %p81_p10, %p80_p9 }
  0x19   :  { %p83_p12 = pnand %p82_p11, %p76_p8 }
  0xa3   :  { %v26_v3 = vpop.xlane.xlu0 %25 }
  0xa4   :  { %v27_v4 = vmax.f32 %v26_v3, 1e-16 }
  0xa6   :  { %51 = vrsqrt.f32 %v27_v4 }
  0xb0   :  { %v52_v5 = vpop.eup %51 }
  0xb1   :  { %v29_v6 = vmul.f32 20.0, %v52_v5 }
  0xb3   :  { %v30_v7 = vmul.f32 %v29_v6, %v21_v0 }
  0xb5   :  { %v31_v8 = vpack.c.bf16 %v30_v7, %v30_v7 }
  0xb7   :  { %33 = vst.msk [vmem:[#allocation5] sm:$0xf] %vm32_vm1, %v31_v8 }
  0xb8   :  { %86 = shalt.err (!%p83_p12)
}
  0xb9   :  { %s87_s22 = scalar_lea.hbm %s138_s1, 64 }
  0xba   :  { %p88_p13 = scmp.ne.s32.totalorder %s138_s1, %s87_s22  ;;  %p91_p0 = scmp.lt.u32.totalorder %s87_s22, %s138_s1 }
  0xbc   :  { %p93_p1 = pnand %p91_p0, %p88_p13 }
  0xbe   :  { %96 = shalt.err (!%p93_p1)
}
  0xbf   :  { %43 = dma.vmem_to_hbm [thread:$0]  %s41_s19, 64, %s138_s1, [#allocation4]  }
  0xc0   :  { %99 = dma.done.wait [#allocation4], 64  }
  0xc1   :  { %100 = vsyncadd [#allocation4], 4294967232 }
  0xc2   :  { %47 = vsyncpa [#allocation3], 1 }
  0xc3   :  { %48 = vsyncpa [#allocation4], 1 }

</bundles_post_ra>
